<compile_context>
chip_gen: v5e
topology: v5e:2x2
jax: 0.10.0
libtpu: 0.0.40
codegen_flags: <defaults>
</compile_context>

<pallas_src>
import math

import jax
import jax.numpy as jnp
from jax.experimental import pallas as pl
from jax.experimental.pallas import tpu as pltpu

_LANES = 128
_MAX_TILE_ROWS = 1024  # 1024x128 f32 = 512 KiB/tile; ~86% of HBM roofline in the v6e sweep


# ----------------------------- Pallas kernel -------------------------------

def _drop_path_kernel(scale_ref, x_ref, o_ref):
    # scale_ref: (Bt, 1, 1) float32 per-sample scale (= mask / keep_prob)
    # x_ref/o_ref: (Bt, TILE_ROWS, 128) lane-dense tiles of the flattened input
    o_ref[...] = (x_ref[...] * scale_ref[...]).astype(o_ref.dtype)


def _round_up(a, m):
    return ((a + m - 1) // m) * m


def drop_path_pallas(x, scale):
    """out[b] = x[b] * scale[b] in one fused, lane-dense Pallas pass."""
    B = x.shape[0]
    n = math.prod(x.shape[1:])

    # Flatten each sample to (rows, 128): lane/sublane-dense regardless of the
    # original (C, H, W); real Swin H*W (e.g. 3136) need not be 128-divisible.
    rows = _round_up(pl.cdiv(n, _LANES), 8)  # sublane-aligned
    if rows >= _MAX_TILE_ROWS:
        bt = 1                       # one sample per step, tile its length
        tile_rows = _MAX_TILE_ROWS
        rows_pad = _round_up(rows, tile_rows)
    else:
        # Small per-sample slab (late Swin stages): batch samples per grid step
        # to amortize the ~0.35 us fixed per-step overhead.
        tile_rows = rows
        rows_pad = rows
        bt = max(1, min(B, _MAX_TILE_ROWS // rows))
    b_pad = _round_up(B, bt)

    xf = x.reshape(B, n)
    pad_n = rows_pad * _LANES - n
    if pad_n or b_pad != B:
        # No-op for typical Swin shapes (C*H*W already 128-divisible, B even).
        xf = jnp.pad(xf, ((0, b_pad - B), (0, pad_n)))
    x3 = xf.reshape(b_pad, rows_pad, _LANES)

    scale3 = jnp.pad(scale.astype(jnp.float32), (0, b_pad - B)).reshape(b_pad, 1, 1)

    grid = (b_pad // bt, rows_pad // tile_rows)
    out = pl.pallas_call(
        _drop_path_kernel,
        out_shape=jax.ShapeDtypeStruct((b_pad, rows_pad, _LANES), x.dtype),
        grid=grid,
        in_specs=[
            pl.BlockSpec((bt, 1, 1), lambda b, r: (b, 0, 0)),
            pl.BlockSpec((bt, tile_rows, _LANES), lambda b, r: (b, r, 0)),
        ],
        out_specs=pl.BlockSpec((bt, tile_rows, _LANES), lambda b, r: (b, r, 0)),
        compiler_params=pltpu.CompilerParams(
            # Both axes parallel: lets v7x's 2 TensorCores split every sample;
            # measured ~neutral on single-TC v5e/v6e, so no downside.
            dimension_semantics=("parallel", "parallel")),
    )(scale3, x3)

    out = out.reshape(b_pad, rows_pad * _LANES)
    if pad_n or b_pad != B:
        out = out[:B, :n]
    return out.reshape(x.shape)


# ----------------------------- module forward ------------------------------

def drop_path(x, key, drop_prob=0.0, training=False):
    """Forward-pass semantics of mmdet's drop_path / DropPath module."""
    if drop_prob is None or drop_prob == 0.0 or not training:
        return x  # identity path, no kernel launch (matches the reference)
    keep_prob = 1.0 - drop_prob
    B = x.shape[0]
    # Per-sample binary keep mask floor(keep_prob + U[0,1)), same semantics as
    # torch.rand(...).floor_() (RNG stream differs). Always float32: bf16 floor
    # can mis-round near the decision boundary and mask/keep_prob loses bits.
    u = jax.random.uniform(key, (B,), dtype=jnp.float32)
    mask = jnp.floor(keep_prob + u)
    scale = mask / keep_prob  # fold the x.div(keep_prob) into the mask scalars
    # TODO(synk): biggest real-world win is fusing this scale into the adjacent
    # residual add (out = shortcut + scale_b * branch) at the Swin-block level.
    return drop_path_pallas(x, scale)


# ----------------------------------- main -----------------------------------

if __name__ == "__main__":
    B, C, H, W = 2, 4, 16, 16
    key = jax.random.PRNGKey(0)
    kx, km = jax.random.split(key)
    x = jax.random.normal(kx, (B, C, H, W), dtype=jnp.float32)

    drop_prob = 0.25
    keep_prob = 1.0 - drop_prob

    # training path (the only path that does real work)
    y = drop_path(x, km, drop_prob=drop_prob, training=True)
    y = jax.block_until_ready(y)

    # pure-JAX reference with the same mask
    u_ref = jax.random.uniform(km, (B,), dtype=jnp.float32)
    mask_ref = jnp.floor(keep_prob + u_ref)
    scale_ref = (mask_ref / keep_prob)[:, None, None, None]
    ref = x * scale_ref

    assert y.shape == x.shape and y.dtype == x.dtype
    assert bool(jnp.all(jnp.isfinite(y)))
    assert bool(jnp.allclose(y, ref, atol=1e-6, rtol=1e-6))

    # bf16 path exercises the f32-scale multiply + explicit down-cast store
    x_bf = x.astype(jnp.bfloat16)
    y_bf = jax.block_until_ready(drop_path(x_bf, km, drop_prob=drop_prob, training=True))
    ref_bf = (x_bf.astype(jnp.float32) * scale_ref).astype(jnp.bfloat16)
    assert y_bf.dtype == jnp.bfloat16
    assert bool(jnp.allclose(y_bf.astype(jnp.float32), ref_bf.astype(jnp.float32),
                             atol=1e-2, rtol=1e-2))

    # eval / drop_prob==0 paths are exact identity, matching the reference
    y_eval = drop_path(x, km, drop_prob=drop_prob, training=False)
    assert bool(jnp.array_equal(y_eval, x))
    y_zero = drop_path(x, km, drop_prob=0.0, training=True)
    assert bool(jnp.array_equal(y_zero, x))

    print("KERNEL_OK")
</pallas_src>

<mosaic_0001>
module attributes {stable_mosaic.version = 11 : i64} {
  func.func @_drop_path_kernel(%arg0: i32, %arg1: i32, %arg2: memref<2x1x1xf32, #tpu.memory_space<vmem>>, %arg3: memref<2x8x128xf32, #tpu.memory_space<vmem>>, %arg4: memref<2x8x128xf32, #tpu.memory_space<vmem>>) attributes {dimension_semantics = [#tpu.dimension_semantics<parallel>, #tpu.dimension_semantics<parallel>], iteration_bounds = array<i64: 1, 1>, scalar_prefetch = 0 : i64, scratch_operands = 0 : i64, tpu.core_type = #tpu.core_type<tc>, window_params = [{transform_indices = @transform_0, window_bounds = array<i64: 2, 1, 1>}, {transform_indices = @transform_1, window_bounds = array<i64: 2, 8, 128>}, {transform_indices = @transform_2, window_bounds = array<i64: 2, 8, 128>}]} {
    %c0 = arith.constant 0 : index
    %c0_0 = arith.constant 0 : index
    %c0_1 = arith.constant 0 : index
    %0 = vector.load %arg3[%c0, %c0_0, %c0_1] : memref<2x8x128xf32, #tpu.memory_space<vmem>>, vector<2x8x128xf32>
    %c0_2 = arith.constant 0 : index
    %c0_3 = arith.constant 0 : index
    %c0_4 = arith.constant 0 : index
    %1 = vector.load %arg2[%c0_2, %c0_3, %c0_4] : memref<2x1x1xf32, #tpu.memory_space<vmem>>, vector<2x1x1xf32>
    %2 = vector.broadcast %1 : vector<2x1x1xf32> to vector<2x8x128xf32>
    %3 = arith.mulf %0, %2 : vector<2x8x128xf32>
    %c0_5 = arith.constant 0 : index
    %c0_6 = arith.constant 0 : index
    %c0_7 = arith.constant 0 : index
    %4 = vector.load %arg4[%c0_5, %c0_6, %c0_7] : memref<2x8x128xf32, #tpu.memory_space<vmem>>, vector<2x8x128xf32>
    tpu.vector_store %arg4[%c0_5, %c0_6, %c0_7], %3 {strides = array<i32>} : memref<2x8x128xf32, #tpu.memory_space<vmem>>, vector<2x8x128xf32>,
    return
  }
  func.func @transform_0(%arg0: i32, %arg1: i32) -> (i32, i32, i32) {
    %c0_i32 = arith.constant 0 : i32
    %c0_i32_0 = arith.constant 0 : i32
    %c0_i32_1 = arith.constant 0 : i32
    return %arg0, %c0_i32, %c0_i32_0 : i32, i32, i32
  }
  func.func @transform_1(%arg0: i32, %arg1: i32) -> (i32, i32, i32) {
    %c0_i32 = arith.constant 0 : i32
    %c0_i32_0 = arith.constant 0 : i32
    return %arg0, %arg1, %c0_i32 : i32, i32, i32
  }
  func.func @transform_2(%arg0: i32, %arg1: i32) -> (i32, i32, i32) {
    %c0_i32 = arith.constant 0 : i32
    %c0_i32_0 = arith.constant 0 : i32
    return %arg0, %arg1, %c0_i32 : i32, i32, i32
  }
}

</mosaic_0001>

<bundles_post_ra>
// kernel: tpu_custom_call.1
= control target key start
LH: loop header
LB: loop body
LE: loop exit
PB: predicated region body
PF: predicated region fallthrough
CT: control target
= control target key end

     0   :  { %7 = vsyncpa [#allocation3], 0  ;;  %s159_s0 = inlined_call_operand.vmem [shape: f32[2,1,1], index: 0, kind: input, shape index: {}]   ;;  %s160_s1 = inlined_call_operand.hbm [shape: f32[2,8,128], index: 1, kind: input, shape index: {}]   ;;  %s161_s2 = inlined_call_operand.hbm [shape: f32[2,8,128], index: 2, kind: output, shape index: {}]  }
   0x1   :  { %8 = vsyncpa [#allocation4], 0  ;;  %s15_s11 = sshll.u32 %s160_s1, 4  ;;  %s127_s12 = smov [#allocation2]   ;;  %s16_s11 = int_to_ptr.hbm [resolvable:$true] %s15_s11 }
   0x2   :  { %s17_s13 = sshll.u32 %s127_s12, 4  ;;  %s128_s14 = smov 128   ;;  %s18_s13 = int_to_ptr.vmem [resolvable:$true] %s17_s13 }
   0x3   :  { %s129_s15 = smov 8  }
   0x4   :  { %23 = dma.hbm_to_vmem [thread:$0]  %s16_s11, 256, %s18_s13, [#allocation3], %s128_s14, %s128_s14, %s129_s15  }
   0x5   :  { %123 = dma.done.wait [#allocation3], 256  }
   0x6   :  { %124 = vsyncadd [#allocation3], 4294967040  ;;  %v130_v0 = vmov 0   ;;  %v73_v1 = vld [vmem:[%s159_s0] ss:$0 sm:$0xff]  ;;  %v29_v6 = vld [vmem:[#allocation2 + $0x8] sm:$0xff] }
   0x7   :  { %72 = vset.pattern.permute.xlu0 %v130_v0  ;;  %v74_v2 = vld [vmem:[%s159_s0 + $0x1] ss:$0 sm:$0xff]  ;;  %s131_s1 = smov [#allocation5]   ;;  %s54_s23 = sshll.u32 %s161_s2, 4  ;;  %s55_s23 = int_to_ptr.hbm [resolvable:$true] %s54_s23 }
   0x8   :  { %37 = vperm.xlu0 %72, %v73_v1   ;;  %v28_v3 = vld [vmem:[#allocation2] sm:$0xff]  ;;  %s52_s20 = sshll.u32 %s131_s1, 4  ;;  %s53_s20 = int_to_ptr.vmem [resolvable:$true] %s52_s20 }
  0x10   :  { %41 = vperm.xlu0 %72, %v74_v2  }
  0x7a   :  { %v38_v4 = vpop.permute.xlu0 %37 }
  0x7b   :  { %v44_v5 = vmul.f32 %v38_v4, %v28_v3 }
  0x7d   :  { %46 = vst [vmem:[#allocation5] sm:$0xff] %v44_v5 }
  0x82   :  { %v42_v7 = vpop.permute.xlu0 %41 }
  0x83   :  { %v45_v8 = vmul.f32 %v42_v7, %v29_v6 }
  0x85   :  { %47 = vst [vmem:[#allocation5 + $0x8] sm:$0xff] %v45_v8 }
  0x86   :  { %60 = dma.vmem_to_hbm [thread:$0]  %s53_s20, 256, %s55_s23, [#allocation4], %s128_s14, %s128_s14, %s129_s15  }
  0x87   :  { %125 = dma.done.wait [#allocation4], 256  }
  0x88   :  { %126 = vsyncadd [#allocation4], 4294967040 }
  0x89   :  { %65 = vsyncpa [#allocation3], 1 }
  0x8a   :  { %66 = vsyncpa [#allocation4], 1 }

</bundles_post_ra>
